<compile_context>
chip_gen: v5e
topology: v5e:2x2
jax: 0.10.0
libtpu: 0.0.40
codegen_flags: <defaults>
</compile_context>

<pallas_src>
import jax
import jax.numpy as jnp
from jax.experimental import pallas as pl
from jax.experimental.pallas import tpu as pltpu


_SUBLANES = 8  # f32 vreg sublane count; batch is padded to this inside the wrapper


def _make_lstm_decoder_kernel(seq, hidden_size, predict_backward):
    H = hidden_size

    def kernel(h0_ref, wih_ref, bias_ref, wfused_ref, bfused_ref,
               xhat_ref, hout_ref, cout_ref):
        # Gate layout along lanes: [ i | f | g | o ], each H wide (PyTorch LSTMCell order).
        # Two full-width EUP passes (sigmoid, tanh of ALL gates at once); pltpu.roll (XLU)
        # aligns f / g / o onto lanes [0:H].  Lanes [H:4H] of c_full / h_full carry bounded
        # garbage that is never read back (elementwise updates can't mix lanes, the fused
        # weight has zero rows [H:4H], and the wrapper slices outputs back to [:H]).
        def step(gates, c_full):
            s = jax.nn.sigmoid(gates)                   # [sig i | sig f | sig g | sig o]
            t = jnp.tanh(gates)                         # [tanh i| tanh f| tanh g| tanh o]
            f_al = pltpu.roll(s, shift=3 * H, axis=1)   # sig(f)  -> lanes [0:H]
            g_al = pltpu.roll(t, shift=2 * H, axis=1)   # tanh(g) -> lanes [0:H]
            o_al = pltpu.roll(s, shift=1 * H, axis=1)   # sig(o)  -> lanes [0:H]
            c_new = f_al * c_full + s * g_al            # i (= s[:, :H]) already aligned
            h_new = o_al * jnp.tanh(c_new)
            return h_new, c_new

        # ---- t == 0 : hidden/cell state is zero, input is the original h0. ----
        gates = (jnp.dot(h0_ref[...], wih_ref[...],
                         preferred_element_type=jnp.float32) + bias_ref[...])
        h_full, c_full = step(gates, jnp.zeros_like(gates))
        xhat_ref[0] = h_full

        # ---- t = 1 .. seq-1 : one fused bf16 MXU pass per step. ----
        # seq is a small static Python int -> fully unrolled at trace time; every x_hat
        # row index below is a compile-time constant.
        for t in range(1, seq):
            gates = (jnp.dot(h_full.astype(jnp.bfloat16), wfused_ref[...],
                             preferred_element_type=jnp.float32) + bfused_ref[...])
            h_full, c_full = step(gates, c_full)
            idx = (seq - t) if predict_backward else t      # (-t) % seq
            xhat_ref[idx] = h_full

        # Final (h, c): written exactly once.
        hout_ref[...] = h_full
        cout_ref[...] = c_full

    return kernel


def lstm_decoder_forward(h0, params, sequence_length, predict_backward=True):
    """Pallas implementation of LSTMDecoder.forward (num_layers == 1)."""
    B, input_size = h0.shape
    H = params["w_hh"].shape[0] // 4
    G = 4 * H
    use_linear = input_size != H
    seq = int(sequence_length)
    assert seq >= 1, "sequence_length must be >= 1"

    hp = jax.lax.Precision.HIGHEST
    f32 = jnp.float32

    # ---- parameter prep / algebraic folding (glue, outside the kernel) ----
    wih_t = params["w_ih"].T.astype(f32)                               # (in, 4H)
    whh_t = params["w_hh"].T.astype(f32)                               # (H, 4H)
    bias = (params["b_ih"] + params["b_hh"]).reshape(1, G).astype(f32)
    if use_linear:
        wlin_t = params["w_lin"].T.astype(f32)                         # (H, in)
        blin = params["b_lin"].reshape(1, input_size).astype(f32)
        w_fused = jnp.dot(wlin_t, wih_t, precision=hp) + whh_t         # (H, 4H)
        b_fused = jnp.dot(blin, wih_t, precision=hp) + bias            # (1, 4H)
    else:
        w_fused = wih_t + whh_t                                        # (H, 4H)
        b_fused = bias                                                 # (1, 4H)

    # bf16 MXU operands; gate/state math stays f32 inside the kernel.
    BP = _SUBLANES                                   # batch padded to a full sublane set
    in_pad = -(-input_size // 128) * 128             # pad the t==0 contraction dim to lanes
    h0_pad = (jnp.zeros((BP, in_pad), f32)
              .at[:B, :input_size].set(h0.astype(f32))).astype(jnp.bfloat16)
    wih_pad = (jnp.zeros((in_pad, G), f32)
               .at[:input_size, :].set(wih_t)).astype(jnp.bfloat16)
    # Fused recurrence weight zero-padded to (4H, 4H): rows [H:4H] are zero, so the
    # full-width h carry (garbage in lanes [H:4H]) feeds the MXU directly — no lane extract.
    w_fused_pad = (jnp.zeros((G, G), f32).at[:H, :].set(w_fused)).astype(jnp.bfloat16)

    kernel = _make_lstm_decoder_kernel(seq, H, predict_backward)

    out_shapes = (
        jax.ShapeDtypeStruct((seq, BP, G), f32),   # x_hat (padded batch, full lane width)
        jax.ShapeDtypeStruct((BP, G), f32),        # h_n
        jax.ShapeDtypeStruct((BP, G), f32),        # c_n
    )

    # Single kernel invocation, no grid: everything (a few tens of KiB) stays resident in
    # VMEM; outputs are lane-dense (last dim 4H = 128) so stores are unmasked vst.
    x_full, h_full, c_full = pl.pallas_call(
        kernel,
        out_shape=out_shapes,
    )(h0_pad, wih_pad, bias, w_fused_pad, b_fused)

    # Slice padded batch rows / garbage lanes back off (wrapper-side glue).
    x_hat = x_full[:, :B, :H]
    h_n = h_full[:B, :H]
    c_n = c_full[:B, :H]
    return x_hat, (h_n, c_n)


def lstm_decoder_reference(h0, params, sequence_length, predict_backward=True):
    """Pure-JAX reference matching the PyTorch forward semantics (unfused, f32)."""
    B, input_size = h0.shape
    hidden_size = params["w_hh"].shape[0] // 4
    use_linear = input_size != hidden_size
    wih, whh = params["w_ih"], params["w_hh"]
    b = params["b_ih"] + params["b_hh"]

    h = jnp.zeros((B, hidden_size), jnp.float32)
    c = jnp.zeros((B, hidden_size), jnp.float32)
    x_hat = jnp.zeros((sequence_length, B, hidden_size), jnp.float32)
    x_in = h0
    for t in range(sequence_length):
        gates = x_in @ wih.T + h @ whh.T + b
        i = jax.nn.sigmoid(gates[:, :hidden_size])
        f = jax.nn.sigmoid(gates[:, hidden_size:2 * hidden_size])
        g = jnp.tanh(gates[:, 2 * hidden_size:3 * hidden_size])
        o = jax.nn.sigmoid(gates[:, 3 * hidden_size:])
        c = f * c + i * g
        h = o * jnp.tanh(c)
        idx = (-t) % sequence_length if predict_backward else t
        x_hat = x_hat.at[idx].set(h)
        x_in = (h @ params["w_lin"].T + params["b_lin"]) if use_linear else h
    return x_hat, (h, c)


def _make_params(key, input_size, hidden_size, use_linear):
    k = jax.random.split(key, 7)
    scale = 1.0 / jnp.sqrt(hidden_size)
    p = {
        "w_ih": jax.random.uniform(k[0], (4 * hidden_size, input_size),
                                   jnp.float32, -scale, scale),
        "w_hh": jax.random.uniform(k[1], (4 * hidden_size, hidden_size),
                                   jnp.float32, -scale, scale),
        "b_ih": jax.random.uniform(k[2], (4 * hidden_size,), jnp.float32, -scale, scale),
        "b_hh": jax.random.uniform(k[3], (4 * hidden_size,), jnp.float32, -scale, scale),
    }
    if use_linear:
        p["w_lin"] = jax.random.uniform(k[4], (input_size, hidden_size),
                                        jnp.float32, -scale, scale),
    if use_linear:
        p["w_lin"] = jax.random.uniform(k[4], (input_size, hidden_size),
                                        jnp.float32, -scale, scale)
        p["b_lin"] = jax.random.uniform(k[5], (input_size,), jnp.float32, -scale, scale)
    return p, k[6]


if __name__ == "__main__":
    key = jax.random.PRNGKey(0)
    key1, key2 = jax.random.split(key)

    # bf16 MXU operands (per perf review) -> relaxed tolerance vs the f32 reference.
    ATOL = RTOL = 3e-2

    # Config 1: LSTMDecoder(input_size=16, hidden_size=32, sequence_length=8,
    #                       predict_backward=True), batch = 2  (Linear re-projection active).
    batch, input_size, hidden_size, seq_len = 2, 16, 32, 8
    params1, kh1 = _make_params(key1, input_size, hidden_size, use_linear=True)
    h0_1 = jax.random.normal(kh1, (batch, input_size), jnp.float32)

    x_hat, (h_n, c_n) = lstm_decoder_forward(h0_1, params1, seq_len, predict_backward=True)
    jax.block_until_ready((x_hat, h_n, c_n))
    x_ref, (h_ref, c_ref) = lstm_decoder_reference(h0_1, params1, seq_len, predict_backward=True)
    assert x_hat.shape == (seq_len, batch, hidden_size)
    assert jnp.allclose(x_hat, x_ref, atol=ATOL, rtol=RTOL)
    assert jnp.allclose(h_n, h_ref, atol=ATOL, rtol=RTOL)
    assert jnp.allclose(c_n, c_ref, atol=ATOL, rtol=RTOL)

    # Config 2: input_size == hidden_size (no Linear), predict_backward=False.
    input_size2 = hidden_size
    params2, kh2 = _make_params(key2, input_size2, hidden_size, use_linear=False)
    h0_2 = jax.random.normal(kh2, (batch, input_size2), jnp.float32)

    x_hat2, (h_n2, c_n2) = lstm_decoder_forward(h0_2, params2, seq_len, predict_backward=False)
    jax.block_until_ready((x_hat2, h_n2, c_n2))
    x_ref2, (h_ref2, c_ref2) = lstm_decoder_reference(h0_2, params2, seq_len,
                                                      predict_backward=False)
    assert jnp.allclose(x_hat2, x_ref2, atol=ATOL, rtol=RTOL)
    assert jnp.allclose(h_n2, h_ref2, atol=ATOL, rtol=RTOL)
    assert jnp.allclose(c_n2, c_ref2, atol=ATOL, rtol=RTOL)

    print("KERNEL_OK")
</pallas_src>

<mosaic_0001>
module attributes {stable_mosaic.version = 11 : i64} {
  func.func @kernel(%arg0: memref<8x128xbf16, #tpu.memory_space<vmem>>, %arg1: memref<128x128xbf16, #tpu.memory_space<vmem>>, %arg2: memref<1x128xf32, #tpu.memory_space<vmem>>, %arg3: memref<128x128xbf16, #tpu.memory_space<vmem>>, %arg4: memref<1x128xf32, #tpu.memory_space<vmem>>, %arg5: memref<8x8x128xf32, #tpu.memory_space<vmem>>, %arg6: memref<8x128xf32, #tpu.memory_space<vmem>>, %arg7: memref<8x128xf32, #tpu.memory_space<vmem>>) attributes {dimension_semantics = [], scalar_prefetch = 0 : i64, scratch_operands = 0 : i64, tpu.core_type = #tpu.core_type<tc>} {
    %c0 = arith.constant 0 : index
    %c0_0 = arith.constant 0 : index
    %0 = vector.load %arg0[%c0, %c0_0] : memref<8x128xbf16, #tpu.memory_space<vmem>>, vector<8x128xbf16>
    %c0_1 = arith.constant 0 : index
    %c0_2 = arith.constant 0 : index
    %1 = vector.load %arg1[%c0_1, %c0_2] : memref<128x128xbf16, #tpu.memory_space<vmem>>, vector<128x128xbf16>
    %cst = arith.constant dense<0.000000e+00> : vector<8x128xf32>
    %2 = tpu.matmul %0, %1, %cst {dimension_numbers = #tpu.dot_dimension_numbers<[1], [0], [0], [1], [0, 0, 1, 1], [], []>} : vector<8x128xbf16>, vector<128x128xbf16>, vector<8x128xf32> -> vector<8x128xf32>
    %c0_3 = arith.constant 0 : index
    %c0_4 = arith.constant 0 : index
    %3 = vector.load %arg2[%c0_3, %c0_4] : memref<1x128xf32, #tpu.memory_space<vmem>>, vector<1x128xf32>
    %4 = vector.broadcast %3 : vector<1x128xf32> to vector<8x128xf32>
    %5 = arith.addf %2, %4 : vector<8x128xf32>
    %cst_5 = arith.constant 0.000000e+00 : f32
    %6 = vector.broadcast %cst_5 : f32 to vector<8x128xf32>
    %7 = arith.negf %5 : vector<8x128xf32>
    %8 = math.exp %7 : vector<8x128xf32>
    %cst_6 = arith.constant 1.000000e+00 : f32
    %9 = vector.broadcast %cst_6 : f32 to vector<8x128xf32>
    %10 = arith.addf %9, %8 : vector<8x128xf32>
    %11 = arith.divf %9, %10 : vector<8x128xf32>
    %12 = math.tanh %5 : vector<8x128xf32>
    %c96_i32 = arith.constant 96 : i32
    %13 = tpu.dynamic_rotate %11 by %c96_i32 dim 1 : vector<8x128xf32>, i32 -> vector<8x128xf32>
    %c64_i32 = arith.constant 64 : i32
    %14 = tpu.dynamic_rotate %12 by %c64_i32 dim 1 : vector<8x128xf32>, i32 -> vector<8x128xf32>
    %c32_i32 = arith.constant 32 : i32
    %15 = tpu.dynamic_rotate %11 by %c32_i32 dim 1 : vector<8x128xf32>, i32 -> vector<8x128xf32>
    %16 = arith.mulf %13, %6 : vector<8x128xf32>
    %17 = arith.mulf %11, %14 : vector<8x128xf32>
    %18 = arith.addf %16, %17 : vector<8x128xf32>
    %19 = math.tanh %18 : vector<8x128xf32>
    %20 = arith.mulf %15, %19 : vector<8x128xf32>
    %c0_7 = arith.constant 0 : index
    %c0_8 = arith.constant 0 : index
    %c0_9 = arith.constant 0 : index
    %21 = vector.load %arg5[%c0_7, %c0_8, %c0_9] : memref<8x8x128xf32, #tpu.memory_space<vmem>>, vector<1x8x128xf32>
    %22 = vector.shape_cast %21 : vector<1x8x128xf32> to vector<8x128xf32>
    %23 = vector.shape_cast %20 : vector<8x128xf32> to vector<1x8x128xf32>
    tpu.vector_store %arg5[%c0_7, %c0_8, %c0_9], %23 {strides = array<i32>} : memref<8x8x128xf32, #tpu.memory_space<vmem>>, vector<1x8x128xf32>,
    %24 = arith.truncf %20 : vector<8x128xf32> to vector<8x128xbf16>
    %c0_10 = arith.constant 0 : index
    %c0_11 = arith.constant 0 : index
    %25 = vector.load %arg3[%c0_10, %c0_11] : memref<128x128xbf16, #tpu.memory_space<vmem>>, vector<128x128xbf16>
    %cst_12 = arith.constant dense<0.000000e+00> : vector<8x128xf32>
    %26 = tpu.matmul %24, %25, %cst_12 {dimension_numbers = #tpu.dot_dimension_numbers<[1], [0], [0], [1], [0, 0, 1, 1], [], []>} : vector<8x128xbf16>, vector<128x128xbf16>, vector<8x128xf32> -> vector<8x128xf32>
    %c0_13 = arith.constant 0 : index
    %c0_14 = arith.constant 0 : index
    %27 = vector.load %arg4[%c0_13, %c0_14] : memref<1x128xf32, #tpu.memory_space<vmem>>, vector<1x128xf32>
    %28 = vector.broadcast %27 : vector<1x128xf32> to vector<8x128xf32>
    %29 = arith.addf %26, %28 : vector<8x128xf32>
    %30 = arith.negf %29 : vector<8x128xf32>
    %31 = math.exp %30 : vector<8x128xf32>
    %cst_15 = arith.constant 1.000000e+00 : f32
    %32 = vector.broadcast %cst_15 : f32 to vector<8x128xf32>
    %33 = arith.addf %32, %31 : vector<8x128xf32>
    %34 = arith.divf %32, %33 : vector<8x128xf32>
    %35 = math.tanh %29 : vector<8x128xf32>
    %c96_i32_16 = arith.constant 96 : i32
    %36 = tpu.dynamic_rotate %34 by %c96_i32_16 dim 1 : vector<8x128xf32>, i32 -> vector<8x128xf32>
    %c64_i32_17 = arith.constant 64 : i32
    %37 = tpu.dynamic_rotate %35 by %c64_i32_17 dim 1 : vector<8x128xf32>, i32 -> vector<8x128xf32>
    %c32_i32_18 = arith.constant 32 : i32
    %38 = tpu.dynamic_rotate %34 by %c32_i32_18 dim 1 : vector<8x128xf32>, i32 -> vector<8x128xf32>
    %39 = arith.mulf %36, %18 : vector<8x128xf32>
    %40 = arith.mulf %34, %37 : vector<8x128xf32>
    %41 = arith.addf %39, %40 : vector<8x128xf32>
    %42 = math.tanh %41 : vector<8x128xf32>
    %43 = arith.mulf %38, %42 : vector<8x128xf32>
    %c7 = arith.constant 7 : index
    %c0_19 = arith.constant 0 : index
    %c0_20 = arith.constant 0 : index
    %44 = vector.load %arg5[%c7, %c0_19, %c0_20] : memref<8x8x128xf32, #tpu.memory_space<vmem>>, vector<1x8x128xf32>
    %45 = vector.shape_cast %44 : vector<1x8x128xf32> to vector<8x128xf32>
    %46 = vector.shape_cast %43 : vector<8x128xf32> to vector<1x8x128xf32>
    tpu.vector_store %arg5[%c7, %c0_19, %c0_20], %46 {strides = array<i32>} : memref<8x8x128xf32, #tpu.memory_space<vmem>>, vector<1x8x128xf32>,
    %47 = arith.truncf %43 : vector<8x128xf32> to vector<8x128xbf16>
    %c0_21 = arith.constant 0 : index
    %c0_22 = arith.constant 0 : index
    %48 = vector.load %arg3[%c0_21, %c0_22] : memref<128x128xbf16, #tpu.memory_space<vmem>>, vector<128x128xbf16>
    %cst_23 = arith.constant dense<0.000000e+00> : vector<8x128xf32>
    %49 = tpu.matmul %47, %48, %cst_23 {dimension_numbers = #tpu.dot_dimension_numbers<[1], [0], [0], [1], [0, 0, 1, 1], [], []>} : vector<8x128xbf16>, vector<128x128xbf16>, vector<8x128xf32> -> vector<8x128xf32>
    %c0_24 = arith.constant 0 : index
    %c0_25 = arith.constant 0 : index
    %50 = vector.load %arg4[%c0_24, %c0_25] : memref<1x128xf32, #tpu.memory_space<vmem>>, vector<1x128xf32>
    %51 = vector.broadcast %50 : vector<1x128xf32> to vector<8x128xf32>
    %52 = arith.addf %49, %51 : vector<8x128xf32>
    %53 = arith.negf %52 : vector<8x128xf32>
    %54 = math.exp %53 : vector<8x128xf32>
    %cst_26 = arith.constant 1.000000e+00 : f32
    %55 = vector.broadcast %cst_26 : f32 to vector<8x128xf32>
    %56 = arith.addf %55, %54 : vector<8x128xf32>
    %57 = arith.divf %55, %56 : vector<8x128xf32>
    %58 = math.tanh %52 : vector<8x128xf32>
    %c96_i32_27 = arith.constant 96 : i32
    %59 = tpu.dynamic_rotate %57 by %c96_i32_27 dim 1 : vector<8x128xf32>, i32 -> vector<8x128xf32>
    %c64_i32_28 = arith.constant 64 : i32
    %60 = tpu.dynamic_rotate %58 by %c64_i32_28 dim 1 : vector<8x128xf32>, i32 -> vector<8x128xf32>
    %c32_i32_29 = arith.constant 32 : i32
    %61 = tpu.dynamic_rotate %57 by %c32_i32_29 dim 1 : vector<8x128xf32>, i32 -> vector<8x128xf32>
    %62 = arith.mulf %59, %41 : vector<8x128xf32>
    %63 = arith.mulf %57, %60 : vector<8x128xf32>
    %64 = arith.addf %62, %63 : vector<8x128xf32>
    %65 = math.tanh %64 : vector<8x128xf32>
    %66 = arith.mulf %61, %65 : vector<8x128xf32>
    %c6 = arith.constant 6 : index
    %c0_30 = arith.constant 0 : index
    %c0_31 = arith.constant 0 : index
    %67 = vector.load %arg5[%c6, %c0_30, %c0_31] : memref<8x8x128xf32, #tpu.memory_space<vmem>>, vector<1x8x128xf32>
    %68 = vector.shape_cast %67 : vector<1x8x128xf32> to vector<8x128xf32>
    %69 = vector.shape_cast %66 : vector<8x128xf32> to vector<1x8x128xf32>
    tpu.vector_store %arg5[%c6, %c0_30, %c0_31], %69 {strides = array<i32>} : memref<8x8x128xf32, #tpu.memory_space<vmem>>, vector<1x8x128xf32>,
    %70 = arith.truncf %66 : vector<8x128xf32> to vector<8x128xbf16>
    %c0_32 = arith.constant 0 : index
    %c0_33 = arith.constant 0 : index
    %71 = vector.load %arg3[%c0_32, %c0_33] : memref<128x128xbf16, #tpu.memory_space<vmem>>, vector<128x128xbf16>
    %cst_34 = arith.constant dense<0.000000e+00> : vector<8x128xf32>
    %72 = tpu.matmul %70, %71, %cst_34 {dimension_numbers = #tpu.dot_dimension_numbers<[1], [0], [0], [1], [0, 0, 1, 1], [], []>} : vector<8x128xbf16>, vector<128x128xbf16>, vector<8x128xf32> -> vector<8x128xf32>
    %c0_35 = arith.constant 0 : index
    %c0_36 = arith.constant 0 : index
    %73 = vector.load %arg4[%c0_35, %c0_36] : memref<1x128xf32, #tpu.memory_space<vmem>>, vector<1x128xf32>
    %74 = vector.broadcast %73 : vector<1x128xf32> to vector<8x128xf32>
    %75 = arith.addf %72, %74 : vector<8x128xf32>
    %76 = arith.negf %75 : vector<8x128xf32>
    %77 = math.exp %76 : vector<8x128xf32>
    %cst_37 = arith.constant 1.000000e+00 : f32
    %78 = vector.broadcast %cst_37 : f32 to vector<8x128xf32>
    %79 = arith.addf %78, %77 : vector<8x128xf32>
    %80 = arith.divf %78, %79 : vector<8x128xf32>
    %81 = math.tanh %75 : vector<8x128xf32>
    %c96_i32_38 = arith.constant 96 : i32
    %82 = tpu.dynamic_rotate %80 by %c96_i32_38 dim 1 : vector<8x128xf32>, i32 -> vector<8x128xf32>
    %c64_i32_39 = arith.constant 64 : i32
    %83 = tpu.dynamic_rotate %81 by %c64_i32_39 dim 1 : vector<8x128xf32>, i32 -> vector<8x128xf32>
    %c32_i32_40 = arith.constant 32 : i32
    %84 = tpu.dynamic_rotate %80 by %c32_i32_40 dim 1 : vector<8x128xf32>, i32 -> vector<8x128xf32>
    %85 = arith.mulf %82, %64 : vector<8x128xf32>
    %86 = arith.mulf %80, %83 : vector<8x128xf32>
    %87 = arith.addf %85, %86 : vector<8x128xf32>
    %88 = math.tanh %87 : vector<8x128xf32>
    %89 = arith.mulf %84, %88 : vector<8x128xf32>
    %c5 = arith.constant 5 : index
    %c0_41 = arith.constant 0 : index
    %c0_42 = arith.constant 0 : index
    %90 = vector.load %arg5[%c5, %c0_41, %c0_42] : memref<8x8x128xf32, #tpu.memory_space<vmem>>, vector<1x8x128xf32>
    %91 = vector.shape_cast %90 : vector<1x8x128xf32> to vector<8x128xf32>
    %92 = vector.shape_cast %89 : vector<8x128xf32> to vector<1x8x128xf32>
    tpu.vector_store %arg5[%c5, %c0_41, %c0_42], %92 {strides = array<i32>} : memref<8x8x128xf32, #tpu.memory_space<vmem>>, vector<1x8x128xf32>,
    %93 = arith.truncf %89 : vector<8x128xf32> to vector<8x128xbf16>
    %c0_43 = arith.constant 0 : index
    %c0_44 = arith.constant 0 : index
    %94 = vector.load %arg3[%c0_43, %c0_44] : memref<128x128xbf16, #tpu.memory_space<vmem>>, vector<128x128xbf16>
    %cst_45 = arith.constant dense<0.000000e+00> : vector<8x128xf32>
    %95 = tpu.matmul %93, %94, %cst_45 {dimension_numbers = #tpu.dot_dimension_numbers<[1], [0], [0], [1], [0, 0, 1, 1], [], []>} : vector<8x128xbf16>, vector<128x128xbf16>, vector<8x128xf32> -> vector<8x128xf32>
    %c0_46 = arith.constant 0 : index
    %c0_47 = arith.constant 0 : index
    %96 = vector.load %arg4[%c0_46, %c0_47] : memref<1x128xf32, #tpu.memory_space<vmem>>, vector<1x128xf32>
    %97 = vector.broadcast %96 : vector<1x128xf32> to vector<8x128xf32>
    %98 = arith.addf %95, %97 : vector<8x128xf32>
    %99 = arith.negf %98 : vector<8x128xf32>
    %100 = math.exp %99 : vector<8x128xf32>
    %cst_48 = arith.constant 1.000000e+00 : f32
    %101 = vector.broadcast %cst_48 : f32 to vector<8x128xf32>
    %102 = arith.addf %101, %100 : vector<8x128xf32>
    %103 = arith.divf %101, %102 : vector<8x128xf32>
    %104 = math.tanh %98 : vector<8x128xf32>
    %c96_i32_49 = arith.constant 96 : i32
    %105 = tpu.dynamic_rotate %103 by %c96_i32_49 dim 1 : vector<8x128xf32>, i32 -> vector<8x128xf32>
    %c64_i32_50 = arith.constant 64 : i32
    %106 = tpu.dynamic_rotate %104 by %c64_i32_50 dim 1 : vector<8x128xf32>, i32 -> vector<8x128xf32>
    %c32_i32_51 = arith.constant 32 : i32
    %107 = tpu.dynamic_rotate %103 by %c32_i32_51 dim 1 : vector<8x128xf32>, i32 -> vector<8x128xf32>
    %108 = arith.mulf %105, %87 : vector<8x128xf32>
    %109 = arith.mulf %103, %106 : vector<8x128xf32>
    %110 = arith.addf %108, %109 : vector<8x128xf32>
    %111 = math.tanh %110 : vector<8x128xf32>
    %112 = arith.mulf %107, %111 : vector<8x128xf32>
    %c4 = arith.constant 4 : index
    %c0_52 = arith.constant 0 : index
    %c0_53 = arith.constant 0 : index
    %113 = vector.load %arg5[%c4, %c0_52, %c0_53] : memref<8x8x128xf32, #tpu.memory_space<vmem>>, vector<1x8x128xf32>
    %114 = vector.shape_cast %113 : vector<1x8x128xf32> to vector<8x128xf32>
    %115 = vector.shape_cast %112 : vector<8x128xf32> to vector<1x8x128xf32>
    tpu.vector_store %arg5[%c4, %c0_52, %c0_53], %115 {strides = array<i32>} : memref<8x8x128xf32, #tpu.memory_space<vmem>>, vector<1x8x128xf32>,
    %116 = arith.truncf %112 : vector<8x128xf32> to vector<8x128xbf16>
    %c0_54 = arith.constant 0 : index
    %c0_55 = arith.constant 0 : index
    %117 = vector.load %arg3[%c0_54, %c0_55] : memref<128x128xbf16, #tpu.memory_space<vmem>>, vector<128x128xbf16>
    %cst_56 = arith.constant dense<0.000000e+00> : vector<8x128xf32>
    %118 = tpu.matmul %116, %117, %cst_56 {dimension_numbers = #tpu.dot_dimension_numbers<[1], [0], [0], [1], [0, 0, 1, 1], [], []>} : vector<8x128xbf16>, vector<128x128xbf16>, vector<8x128xf32> -> vector<8x128xf32>
    %c0_57 = arith.constant 0 : index
    %c0_58 = arith.constant 0 : index
    %119 = vector.load %arg4[%c0_57, %c0_58] : memref<1x128xf32, #tpu.memory_space<vmem>>, vector<1x128xf32>
    %120 = vector.broadcast %119 : vector<1x128xf32> to vector<8x128xf32>
    %121 = arith.addf %118, %120 : vector<8x128xf32>
    %122 = arith.negf %121 : vector<8x128xf32>
    %123 = math.exp %122 : vector<8x128xf32>
    %cst_59 = arith.constant 1.000000e+00 : f32
    %124 = vector.broadcast %cst_59 : f32 to vector<8x128xf32>
    %125 = arith.addf %124, %123 : vector<8x128xf32>
    %126 = arith.divf %124, %125 : vector<8x128xf32>
    %127 = math.tanh %121 : vector<8x128xf32>
    %c96_i32_60 = arith.constant 96 : i32
    %128 = tpu.dynamic_rotate %126 by %c96_i32_60 dim 1 : vector<8x128xf32>, i32 -> vector<8x128xf32>
    %c64_i32_61 = arith.constant 64 : i32
    %129 = tpu.dynamic_rotate %127 by %c64_i32_61 dim 1 : vector<8x128xf32>, i32 -> vector<8x128xf32>
    %c32_i32_62 = arith.constant 32 : i32
    %130 = tpu.dynamic_rotate %126 by %c32_i32_62 dim 1 : vector<8x128xf32>, i32 -> vector<8x128xf32>
    %131 = arith.mulf %128, %110 : vector<8x128xf32>
    %132 = arith.mulf %126, %129 : vector<8x128xf32>
    %133 = arith.addf %131, %132 : vector<8x128xf32>
    %134 = math.tanh %133 : vector<8x128xf32>
    %135 = arith.mulf %130, %134 : vector<8x128xf32>
    %c3 = arith.constant 3 : index
    %c0_63 = arith.constant 0 : index
    %c0_64 = arith.constant 0 : index
    %136 = vector.load %arg5[%c3, %c0_63, %c0_64] : memref<8x8x128xf32, #tpu.memory_space<vmem>>, vector<1x8x128xf32>
    %137 = vector.shape_cast %136 : vector<1x8x128xf32> to vector<8x128xf32>
    %138 = vector.shape_cast %135 : vector<8x128xf32> to vector<1x8x128xf32>
    tpu.vector_store %arg5[%c3, %c0_63, %c0_64], %138 {strides = array<i32>} : memref<8x8x128xf32, #tpu.memory_space<vmem>>, vector<1x8x128xf32>,
    %139 = arith.truncf %135 : vector<8x128xf32> to vector<8x128xbf16>
    %c0_65 = arith.constant 0 : index
    %c0_66 = arith.constant 0 : index
    %140 = vector.load %arg3[%c0_65, %c0_66] : memref<128x128xbf16, #tpu.memory_space<vmem>>, vector<128x128xbf16>
    %cst_67 = arith.constant dense<0.000000e+00> : vector<8x128xf32>
    %141 = tpu.matmul %139, %140, %cst_67 {dimension_numbers = #tpu.dot_dimension_numbers<[1], [0], [0], [1], [0, 0, 1, 1], [], []>} : vector<8x128xbf16>, vector<128x128xbf16>, vector<8x128xf32> -> vector<8x128xf32>
    %c0_68 = arith.constant 0 : index
    %c0_69 = arith.constant 0 : index
    %142 = vector.load %arg4[%c0_68, %c0_69] : memref<1x128xf32, #tpu.memory_space<vmem>>, vector<1x128xf32>
    %143 = vector.broadcast %142 : vector<1x128xf32> to vector<8x128xf32>
    %144 = arith.addf %141, %143 : vector<8x128xf32>
    %145 = arith.negf %144 : vector<8x128xf32>
    %146 = math.exp %145 : vector<8x128xf32>
    %cst_70 = arith.constant 1.000000e+00 : f32
    %147 = vector.broadcast %cst_70 : f32 to vector<8x128xf32>
    %148 = arith.addf %147, %146 : vector<8x128xf32>
    %149 = arith.divf %147, %148 : vector<8x128xf32>
    %150 = math.tanh %144 : vector<8x128xf32>
    %c96_i32_71 = arith.constant 96 : i32
    %151 = tpu.dynamic_rotate %149 by %c96_i32_71 dim 1 : vector<8x128xf32>, i32 -> vector<8x128xf32>
    %c64_i32_72 = arith.constant 64 : i32
    %152 = tpu.dynamic_rotate %150 by %c64_i32_72 dim 1 : vector<8x128xf32>, i32 -> vector<8x128xf32>
    %c32_i32_73 = arith.constant 32 : i32
    %153 = tpu.dynamic_rotate %149 by %c32_i32_73 dim 1 : vector<8x128xf32>, i32 -> vector<8x128xf32>
    %154 = arith.mulf %151, %133 : vector<8x128xf32>
    %155 = arith.mulf %149, %152 : vector<8x128xf32>
    %156 = arith.addf %154, %155 : vector<8x128xf32>
    %157 = math.tanh %156 : vector<8x128xf32>
    %158 = arith.mulf %153, %157 : vector<8x128xf32>
    %c2 = arith.constant 2 : index
    %c0_74 = arith.constant 0 : index
    %c0_75 = arith.constant 0 : index
    %159 = vector.load %arg5[%c2, %c0_74, %c0_75] : memref<8x8x128xf32, #tpu.memory_space<vmem>>, vector<1x8x128xf32>
    %160 = vector.shape_cast %159 : vector<1x8x128xf32> to vector<8x128xf32>
    %161 = vector.shape_cast %158 : vector<8x128xf32> to vector<1x8x128xf32>
    tpu.vector_store %arg5[%c2, %c0_74, %c0_75], %161 {strides = array<i32>} : memref<8x8x128xf32, #tpu.memory_space<vmem>>, vector<1x8x128xf32>,
    %162 = arith.truncf %158 : vector<8x128xf32> to vector<8x128xbf16>
    %c0_76 = arith.constant 0 : index
    %c0_77 = arith.constant 0 : index
    %163 = vector.load %arg3[%c0_76, %c0_77] : memref<128x128xbf16, #tpu.memory_space<vmem>>, vector<128x128xbf16>
    %cst_78 = arith.constant dense<0.000000e+00> : vector<8x128xf32>
    %164 = tpu.matmul %162, %163, %cst_78 {dimension_numbers = #tpu.dot_dimension_numbers<[1], [0], [0], [1], [0, 0, 1, 1], [], []>} : vector<8x128xbf16>, vector<128x128xbf16>, vector<8x128xf32> -> vector<8x128xf32>
    %c0_79 = arith.constant 0 : index
    %c0_80 = arith.constant 0 : index
    %165 = vector.load %arg4[%c0_79, %c0_80] : memref<1x128xf32, #tpu.memory_space<vmem>>, vector<1x128xf32>
    %166 = vector.broadcast %165 : vector<1x128xf32> to vector<8x128xf32>
    %167 = arith.addf %164, %166 : vector<8x128xf32>
    %168 = arith.negf %167 : vector<8x128xf32>
    %169 = math.exp %168 : vector<8x128xf32>
    %cst_81 = arith.constant 1.000000e+00 : f32
    %170 = vector.broadcast %cst_81 : f32 to vector<8x128xf32>
    %171 = arith.addf %170, %169 : vector<8x128xf32>
    %172 = arith.divf %170, %171 : vector<8x128xf32>
    %173 = math.tanh %167 : vector<8x128xf32>
    %c96_i32_82 = arith.constant 96 : i32
    %174 = tpu.dynamic_rotate %172 by %c96_i32_82 dim 1 : vector<8x128xf32>, i32 -> vector<8x128xf32>
    %c64_i32_83 = arith.constant 64 : i32
    %175 = tpu.dynamic_rotate %173 by %c64_i32_83 dim 1 : vector<8x128xf32>, i32 -> vector<8x128xf32>
    %c32_i32_84 = arith.constant 32 : i32
    %176 = tpu.dynamic_rotate %172 by %c32_i32_84 dim 1 : vector<8x128xf32>, i32 -> vector<8x128xf32>
    %177 = arith.mulf %174, %156 : vector<8x128xf32>
    %178 = arith.mulf %172, %175 : vector<8x128xf32>
    %179 = arith.addf %177, %178 : vector<8x128xf32>
    %180 = math.tanh %179 : vector<8x128xf32>
    %181 = arith.mulf %176, %180 : vector<8x128xf32>
    %c1 = arith.constant 1 : index
    %c0_85 = arith.constant 0 : index
    %c0_86 = arith.constant 0 : index
    %182 = vector.load %arg5[%c1, %c0_85, %c0_86] : memref<8x8x128xf32, #tpu.memory_space<vmem>>, vector<1x8x128xf32>
    %183 = vector.shape_cast %182 : vector<1x8x128xf32> to vector<8x128xf32>
    %184 = vector.shape_cast %181 : vector<8x128xf32> to vector<1x8x128xf32>
    tpu.vector_store %arg5[%c1, %c0_85, %c0_86], %184 {strides = array<i32>} : memref<8x8x128xf32, #tpu.memory_space<vmem>>, vector<1x8x128xf32>,
    %c0_87 = arith.constant 0 : index
    %c0_88 = arith.constant 0 : index
    %185 = vector.load %arg6[%c0_87, %c0_88] : memref<8x128xf32, #tpu.memory_space<vmem>>, vector<8x128xf32>
    tpu.vector_store %arg6[%c0_87, %c0_88], %181 {strides = array<i32>} : memref<8x128xf32, #tpu.memory_space<vmem>>, vector<8x128xf32>,
    %c0_89 = arith.constant 0 : index
    %c0_90 = arith.constant 0 : index
    %186 = vector.load %arg7[%c0_89, %c0_90] : memref<8x128xf32, #tpu.memory_space<vmem>>, vector<8x128xf32>
    tpu.vector_store %arg7[%c0_89, %c0_90], %179 {strides = array<i32>} : memref<8x128xf32, #tpu.memory_space<vmem>>, vector<8x128xf32>,
    return
  }
}

</mosaic_0001>

<bundles_post_ra>
// kernel: tpu_custom_call.1
= control target key start
LH: loop header
LB: loop body
LE: loop exit
PB: predicated region body
PF: predicated region fallthrough
CT: control target
= control target key end

     0   :  { %13 = vsyncpa [#allocation3], 0  ;;  %s1728_s0 = inlined_call_operand.hbm [shape: bf16[8,128], index: 0, kind: input, shape index: {}]   ;;  %s1729_s1 = inlined_call_operand.hbm [shape: bf16[128,128], index: 1, kind: input, shape index: {}]   ;;  %s1730_s2 = inlined_call_operand.vmem [shape: f32[1,128], index: 2, kind: input, shape index: {}]   ;;  %s1731_s3 = inlined_call_operand.hbm [shape: bf16[128,128], index: 3, kind: input, shape index: {}]   ;;  %s1732_s4 = inlined_call_operand.vmem [shape: f32[1,128], index: 4, kind: input, shape index: {}]   ;;  %s1733_s5 = inlined_call_operand.hbm [shape: f32[8,8,128], index: 5, kind: output, shape index: {0}]   ;;  %s1734_s6 = inlined_call_operand.hbm [shape: f32[8,128], index: 6, kind: output, shape index: {1}]   ;;  %s1735_s7 = inlined_call_operand.hbm [shape: f32[8,128], index: 7, kind: output, shape index: {2}]  }
   0x1   :  { %14 = vsyncpa [#allocation6], 0 }
   0x2   :  { %15 = vsyncpa [#allocation4], 0  ;;  %s32_s26 = sshll.u32 %s1729_s1, 4  ;;  %s33_s26 = int_to_ptr.hbm [resolvable:$true] %s32_s26 }
   0x3   :  { %16 = vsyncpa [#allocation10], 0  ;;  %s1606_s27 = smov [#allocation5]   ;;  %s22_s8 = sshll.u32 %s1728_s0, 4  ;;  %s23_s8 = int_to_ptr.hbm [resolvable:$true] %s22_s8 }
   0x4   :  { %s34_s28 = sshll.u32 %s1606_s27, 4  ;;  %s1607_s9 = smov 64   ;;  %s35_s28 = int_to_ptr.vmem [resolvable:$true] %s34_s28 }
   0x5   :  { %s1608_s10 = smov 4   ;;  %s1609_s11 = smov [#allocation2]  }
   0x6   :  { %40 = dma.hbm_to_vmem [thread:$0]  %s33_s26, 1024, %s35_s28, [#allocation6], %s1607_s9, %s1607_s9, %s1608_s10  }
   0x7   :  { %s24_s12 = sshll.u32 %s1609_s11, 4  ;;  %s47_s1 = sshll.u32 %s1731_s3, 4  ;;  %s25_s12 = int_to_ptr.vmem [resolvable:$true] %s24_s12  ;;  %s48_s1 = int_to_ptr.hbm [resolvable:$true] %s47_s1 }
   0x8   :  { %27 = dma.hbm_to_vmem [thread:$0]  %s23_s8, 64, %s25_s12, [#allocation3]  }
   0x9   :  { %s1610_s15 = smov [#allocation7]  }
   0xa   :  { %s49_s16 = sshll.u32 %s1610_s15, 4  ;;  %s50_s16 = int_to_ptr.vmem [resolvable:$true] %s49_s16 }
   0xb   :  { %55 = dma.hbm_to_vmem [thread:$0]  %s48_s1, 1024, %s50_s16, [#allocation6], %s1607_s9, %s1607_s9, %s1608_s10  }
   0xc   :  { %1598 = dma.done.wait [#allocation3], 64  }
   0xd   :  { %1599 = vsyncadd [#allocation3], 4294967232 }
   0xe   :  { %1600 = dma.done.wait [#allocation6], 2048  }
   0xf   :  { %1601 = vsyncadd [#allocation6], 4294965248  ;;  %v1313_v0 = vld [vmem:[#allocation5 + $0x38] sm:$0xff]  ;;  %v1312_v1 = vld [vmem:[#allocation5 + $0x30] sm:$0xff]  ;;  %s1612_s17 = smov 96   ;;  %s997_s12 = sshll.u32 %s1733_s5, 4  ;;  %s998_s12 = int_to_ptr.hbm [resolvable:$true] %s997_s12 }
  0x10   :  { %139 = vmatpush.bf16.msra.mxu0 %v1313_v0  ;;  %v1311_v2 = vld [vmem:[#allocation5 + $0x28] sm:$0xff]  ;;  %v1310_v3 = vld [vmem:[#allocation5 + $0x20] sm:$0xff]  ;;  %v1309_v4 = vld [vmem:[#allocation5 + $0x18] sm:$0xff]  ;;  %s1614_s13 = smov [#allocation9]   ;;  %s1011_s16 = sshll.u32 %s1734_s6, 4  ;;  %s1012_s16 = int_to_ptr.hbm [resolvable:$true] %s1011_s16 }
  0x11   :  { %v1308_v5 = vld [vmem:[#allocation5 + $0x10] sm:$0xff]  ;;  %v1307_v6 = vld [vmem:[#allocation5 + $0x8] sm:$0xff]  ;;  %v1306_v7 = vld [vmem:[#allocation5] sm:$0xff]  ;;  %s1009_s14 = sshll.u32 %s1614_s13, 4  ;;  %s1615_s0 = smov [#allocation11]   ;;  %s1010_s14 = int_to_ptr.vmem [resolvable:$true] %s1009_s14 }
  0x12   :  { %v70_v8 = vld [vmem:[#allocation2] sm:$0xf]  ;;  %v1320_v15 = vld [vmem:[#allocation7 + $0x30] sm:$0xff]  ;;  %v1319_v29 = vld [vmem:[#allocation7 + $0x28] sm:$0xff]  ;;  %s1020_s3 = sshll.u32 %s1615_s0, 4  ;;  %s1022_s18 = sshll.u32 %s1735_s7, 4  ;;  %s1021_s3 = int_to_ptr.vmem [resolvable:$true] %s1020_s3  ;;  %s1023_s18 = int_to_ptr.hbm [resolvable:$true] %s1022_s18 }
  0x13   :  { %v1382_v9 = vld [vmem:[%s1730_s2] ss:$0 sm:$0xff]  ;;  %s1611_s2 = smov 32   ;;  %v1318_v30 = vld [vmem:[#allocation7 + $0x20] sm:$0xff]  ;;  %v1316_v32 = vld [vmem:[#allocation7 + $0x10] sm:$0xff]  ;;  %s1616_s5 = smov 128  }
  0x14   :  { %140 = vmatpush.bf16.msra.mxu0 %v1312_v1  ;;  %v1321_v13 = vld [vmem:[#allocation7 + $0x38] sm:$0xff]  ;;  %v1315_v33 = vld [vmem:[#allocation7 + $0x8] sm:$0xff]  ;;  %v1314_v34 = vld [vmem:[#allocation7] sm:$0xff]  ;;  %s1617_s19 = smov 8  }
  0x15   :  { %253 = vmatpush.bf16.msra.mxu1 %v1321_v13  ;;  %v1317_v31 = vld [vmem:[#allocation7 + $0x18] sm:$0xff]  ;;  %v1328_v63 = vld [vmem:[#allocation7 + $0x30] sm:$0xff]  ;;  %v1327_v0 = vld [vmem:[#allocation7 + $0x28] sm:$0xff] }
  0x16   :  { %v1383_v44 = vld [vmem:[%s1732_s4] ss:$0 sm:$0xff]  ;;  %v1326_v1 = vld [vmem:[#allocation7 + $0x20] sm:$0xff] }
  0x17   :  { %v1329_v62 = vld [vmem:[#allocation7 + $0x38] sm:$0xff] }
  0x18   :  { %141 = vmatpush.bf16.msra.mxu0 %v1311_v2  ;;  %368 = vmatpush.bf16.msra.mxu2 %v1329_v62  ;;  %v1325_v2 = vld [vmem:[#allocation7 + $0x18] sm:$0xff] }
  0x19   :  { %254 = vmatpush.bf16.msra.mxu1 %v1320_v15  ;;  %v1384_v15 = vld [vmem:[%s1732_s4] ss:$0 sm:$0xff] }
  0x1c   :  { %142 = vmatpush.bf16.msra.mxu0 %v1310_v3  ;;  %369 = vmatpush.bf16.msra.mxu2 %v1328_v63  ;;  %v1324_v3 = vld [vmem:[#allocation7 + $0x10] sm:$0xff] }
  0x1d   :  { %255 = vmatpush.bf16.msra.mxu1 %v1319_v29 }
  0x20   :  { %143 = vmatpush.bf16.msra.mxu0 %v1309_v4  ;;  %370 = vmatpush.bf16.msra.mxu2 %v1327_v0  ;;  %v1323_v4 = vld [vmem:[#allocation7 + $0x8] sm:$0xff] }
  0x21   :  { %256 = vmatpush.bf16.msra.mxu1 %v1318_v30 }
  0x24   :  { %144 = vmatpush.bf16.msra.mxu0 %v1308_v5  ;;  %371 = vmatpush.bf16.msra.mxu2 %v1326_v1  ;;  %v1322_v5 = vld [vmem:[#allocation7] sm:$0xff] }
  0x25   :  { %257 = vmatpush.bf16.msra.mxu1 %v1317_v31 }
  0x28   :  { %145 = vmatpush.bf16.msra.mxu0 %v1307_v6  ;;  %372 = vmatpush.bf16.msra.mxu2 %v1325_v2 }
  0x29   :  { %258 = vmatpush.bf16.msra.mxu1 %v1316_v32 }
  0x2c   :  { %146 = vmatpush.bf16.msra.mxu0 %v1306_v7  ;;  %373 = vmatpush.bf16.msra.mxu2 %v1324_v3 }
  0x2d   :  { %259 = vmatpush.bf16.msra.mxu1 %v1315_v33  ;;  %v1337_v33 = vld [vmem:[#allocation7 + $0x38] sm:$0xff] }
  0x2e   :  { %483 = vmatpush.bf16.msra.mxu3 %v1337_v33 }
  0x2f   :  { %147 = vmatmul.bf16.vlgmr.msra.gmra.mxu0 %v70_v8 }
  0x30   :  { %374 = vmatpush.bf16.msra.mxu2 %v1323_v4  ;;  %v1345_v4 = vld [vmem:[#allocation7 + $0x38] sm:$0xff] }
  0x31   :  { %260 = vmatpush.bf16.msra.mxu1 %v1314_v34  ;;  %v1336_v34 = vld [vmem:[#allocation7 + $0x30] sm:$0xff]  ;;  %598 = vmatpush.bf16.msrb.mxu0 %v1345_v4 }
  0x32   :  { %484 = vmatpush.bf16.msra.mxu3 %v1336_v34 }
  0x34   :  { %375 = vmatpush.bf16.msra.mxu2 %v1322_v5  ;;  %v1344_v5 = vld [vmem:[#allocation7 + $0x30] sm:$0xff] }
  0x35   :  { %599 = vmatpush.bf16.msrb.mxu0 %v1344_v5 }
  0xac   :  { %v148_v10 = vpop.f32.mrf.mxu0 }
  0xad   :  { %v149_v11 = vadd.f32 %v1382_v9, %v148_v10 }
  0xaf   :  { %v1074_v12 = vmul.f32 -1.442695, %v149_v11 }
  0xb1   :  { %1390 = vpow2.f32 %v1074_v12 }
  0xb4   :  { %v150_v14 = vpop.f32.mrf.mxu0 }
  0xb7   :  { %v1391_v16 = vpop.eup %1390 }
  0xb8   :  { %v155_v17 = vadd.f32 1.0, %v1391_v16 }
  0xba   :  { %1392 = vrcp.f32 %v155_v17  ;;  %v167_v21 = vand.u32 2147483648, %v155_v17  ;;  %v165_v23 = vand.u32 2147483647, %v155_v17  ;;  %vm161_vm1 = vweird.f32 %v155_v17 }
  0xbb   :  { %1394 = vtanh.f32 %v149_v11 }
  0xbc   :  { %v168_v25 = vor.u32 1.1754944e-38, %v167_v21  ;;  %vm166_vm3 = vcmp.eq.f32.partialorder %v165_v23, 8.507059e+37 }
  0xc0   :  { %v1393_v18 = vpop.eup %1392 }
  0xc1   :  { %v157_v19 = vmul.f32 %v1393_v18, %v155_v17  ;;  %vm162_vm0 = vweird.f32 %v1393_v18  ;;  %v1395_v28 = vpop.eup %1394 }
  0xc2   :  { %vm163_vm2 = vmor %vm161_vm1, %vm162_vm0 }
  0xc3   :  { %v158_v20 = vsub.f32 1.0, %v157_v19 }
  0xc5   :  { %v159_v22 = vmul.f32 %v1393_v18, %v158_v20 }
  0xc7   :  { %v160_v24 = vadd.f32 %v1393_v18, %v159_v22 }
  0xc9   :  { %v164_v26 = vsel %vm163_vm2, %v1393_v18, %v160_v24 }
  0xca   :  { %v169_v27 = vsel %vm166_vm3, %v168_v25, %v164_v26 }
  0xcb   :  { %176 = vrot.lane.b32.xlu1 %v169_v27, %s1611_s2  ;;  %172 = vrot.lane.b32.xlu0 %v169_v27, %s1612_s17 }
  0xd3   :  { %174 = vrot.lane.b32.xlu0 %v1395_v28, %s1607_s9 }
 0x13d   :  { %v173_v35 = vpop.permute.xlu0 %172  ;;  %v177_v41 = vpop.permute.xlu1 %176 }
 0x13e   :  { %v178_v37 = vmul.f32 0.0, %v173_v35  ;;  %v1335_v35 = vld [vmem:[#allocation7 + $0x28] sm:$0xff] }
 0x13f   :  { %485 = vmatpush.bf16.msra.mxu3 %v1335_v35 }
 0x145   :  { %v175_v36 = vpop.permute.xlu0 %174 }
 0x146   :  { %v179_v38 = vmul.f32 %v175_v36, %v169_v27  ;;  %v1334_v36 = vld [vmem:[#allocation7 + $0x20] sm:$0xff] }
 0x147   :  { %486 = vmatpush.bf16.msra.mxu3 %v1334_v36 }
 0x148   :  { %v180_v39 = vadd.f32 %v179_v38, %v178_v37  ;;  %v1333_v37 = vld [vmem:[#allocation7 + $0x18] sm:$0xff]  ;;  %v1332_v38 = vld [vmem:[#allocation7 + $0x10] sm:$0xff] }
 0x14a   :  { %1396 = vtanh.f32 %v180_v39 }
 0x14b   :  { %487 = vmatpush.bf16.msra.mxu3 %v1333_v37 }
 0x14f   :  { %488 = vmatpush.bf16.msra.mxu3 %v1332_v38 }
 0x150   :  { %v1397_v40 = vpop.eup %1396 }
 0x151   :  { %v182_v42 = vmul.f32 %v1397_v40, %v177_v41  ;;  %v1330_v40 = vld [vmem:[#allocation7] sm:$0xff] }
 0x153   :  { %183 = vst [vmem:[#allocation8] sm:$0xff] %v182_v42  ;;  %v184_v43 = vpack.c.bf16 %v182_v42, %v182_v42 }
 0x155   :  { %261 = vmatmul.bf16.vlgmr.msra.gmra.mxu1 %v184_v43 }
 0x1d2   :  { %v262_v45 = vpop.f32.mrf.mxu1 }
 0x1d3   :  { %v263_v46 = vadd.f32 %v1383_v44, %v262_v45 }
 0x1d5   :  { %v1107_v47 = vmul.f32 -1.442695, %v263_v46  ;;  %1398 = vtanh.f32 %v263_v46 }
 0x1d7   :  { %1400 = vpow2.f32 %v1107_v47 }
 0x1da   :  { %v264_v48 = vpop.f32.mrf.mxu1 }
 0x1db   :  { %v1399_v49 = vpop.eup %1398 }
 0x1dc   :  { %288 = vrot.lane.b32.xlu2 %v1399_v49, %s1607_s9 }
 0x1dd   :  { %v1401_v50 = vpop.eup %1400 }
 0x1de   :  { %v269_v51 = vadd.f32 1.0, %v1401_v50  ;;  %v1385_v50 = vld [vmem:[%s1732_s4] ss:$0 sm:$0xff] }
 0x1e0   :  { %1402 = vrcp.f32 %v269_v51  ;;  %v281_v55 = vand.u32 2147483648, %v269_v51  ;;  %v279_v57 = vand.u32 2147483647, %v269_v51  ;;  %vm275_vm5 = vweird.f32 %v269_v51 }
 0x1e2   :  { %v282_v59 = vor.u32 1.1754944e-38, %v281_v55  ;;  %vm280_vm7 = vcmp.eq.f32.partialorder %v279_v57, 8.507059e+37 }
 0x1e6   :  { %v1403_v52 = vpop.eup %1402 }
 0x1e7   :  { %v271_v53 = vmul.f32 %v1403_v52, %v269_v51  ;;  %vm276_vm4 = vweird.f32 %v1403_v52 }
 0x1e8   :  { %vm277_vm6 = vmor %vm275_vm5, %vm276_vm4 }
 0x1e9   :  { %v272_v54 = vsub.f32 1.0, %v271_v53 }
 0x1eb   :  { %v273_v56 = vmul.f32 %v1403_v52, %v272_v54 }
 0x1ed   :  { %v274_v58 = vadd.f32 %v1403_v52, %v273_v56 }
 0x1ef   :  { %v278_v60 = vsel %vm277_vm6, %v1403_v52, %v274_v58 }
 0x1f0   :  { %v283_v61 = vsel %vm280_vm7, %v282_v59, %v278_v60 }
 0x1f1   :  { %290 = vrot.lane.b32.xlu2 %v283_v61, %s1611_s2  ;;  %286 = vrot.lane.b32.xlu1 %v283_v61, %s1612_s17 }
 0x236   :  { %v289_v6 = vpop.permute.xlu2 %288 }
 0x237   :  { %v293_v8 = vmul.f32 %v289_v6, %v283_v61  ;;  %v1343_v6 = vld [vmem:[#allocation7 + $0x28] sm:$0xff] }
 0x238   :  { %600 = vmatpush.bf16.msrb.mxu0 %v1343_v6 }
 0x24b   :  { %v291_v12 = vpop.permute.xlu2 %290 }
 0x263   :  { %v287_v7 = vpop.permute.xlu1 %286 }
 0x264   :  { %v292_v9 = vmul.f32 %v287_v7, %v180_v39  ;;  %v1331_v39 = vld [vmem:[#allocation7 + $0x8] sm:$0xff]  ;;  %v1342_v7 = vld [vmem:[#allocation7 + $0x20] sm:$0xff] }
 0x265   :  { %489 = vmatpush.bf16.msra.mxu3 %v1331_v39  ;;  %601 = vmatpush.bf16.msrb.mxu0 %v1342_v7  ;;  %v1353_v39 = vld [vmem:[#allocation7 + $0x38] sm:$0xff] }
 0x266   :  { %v294_v10 = vadd.f32 %v293_v8, %v292_v9  ;;  %v1341_v8 = vld [vmem:[#allocation7 + $0x18] sm:$0xff]  ;;  %v1340_v9 = vld [vmem:[#allocation7 + $0x10] sm:$0xff]  ;;  %713 = vmatpush.bf16.msrb.mxu1 %v1353_v39 }
 0x268   :  { %1404 = vtanh.f32 %v294_v10 }
 0x269   :  { %490 = vmatpush.bf16.msra.mxu3 %v1330_v40  ;;  %602 = vmatpush.bf16.msrb.mxu0 %v1341_v8  ;;  %v1352_v40 = vld [vmem:[#allocation7 + $0x30] sm:$0xff] }
 0x26a   :  { %714 = vmatpush.bf16.msrb.mxu1 %v1352_v40 }
 0x26d   :  { %603 = vmatpush.bf16.msrb.mxu0 %v1340_v9 }
 0x26e   :  { %v1405_v11 = vpop.eup %1404 }
 0x26f   :  { %v296_v13 = vmul.f32 %v1405_v11, %v291_v12  ;;  %v1338_v11 = vld [vmem:[#allocation7] sm:$0xff] }
 0x271   :  { %298 = vst [vmem:[#allocation8 + $0x38] sm:$0xff] %v296_v13  ;;  %v299_v14 = vpack.c.bf16 %v296_v13, %v296_v13 }
 0x273   :  { %376 = vmatmul.bf16.vlgmr.msra.gmra.mxu2 %v299_v14 }
 0x2f6   :  { %v377_v16 = vpop.f32.mrf.mxu2 }
 0x2f7   :  { %v378_v17 = vadd.f32 %v1384_v15, %v377_v16 }
 0x2f9   :  { %v1140_v18 = vmul.f32 -1.442695, %v378_v17  ;;  %1406 = vtanh.f32 %v378_v17 }
 0x2fb   :  { %1408 = vpow2.f32 %v1140_v18 }
 0x2fe   :  { %v379_v19 = vpop.f32.mrf.mxu2 }
 0x2ff   :  { %v1407_v20 = vpop.eup %1406 }
 0x300   :  { %403 = vrot.lane.b32.xlu1 %v1407_v20, %s1607_s9 }
 0x301   :  { %v1409_v21 = vpop.eup %1408 }
 0x302   :  { %v384_v22 = vadd.f32 1.0, %v1409_v21  ;;  %v1386_v21 = vld [vmem:[%s1732_s4] ss:$0 sm:$0xff] }
 0x304   :  { %1410 = vrcp.f32 %v384_v22  ;;  %v396_v26 = vand.u32 2147483648, %v384_v22  ;;  %v394_v28 = vand.u32 2147483647, %v384_v22  ;;  %vm390_vm9 = vweird.f32 %v384_v22 }
 0x306   :  { %v397_v30 = vor.u32 1.1754944e-38, %v396_v26  ;;  %vm395_vm11 = vcmp.eq.f32.partialorder %v394_v28, 8.507059e+37 }
 0x30a   :  { %v1411_v23 = vpop.eup %1410 }
 0x30b   :  { %v386_v24 = vmul.f32 %v1411_v23, %v384_v22  ;;  %vm391_vm8 = vweird.f32 %v1411_v23 }
 0x30c   :  { %vm392_vm10 = vmor %vm390_vm9, %vm391_vm8 }
 0x30d   :  { %v387_v25 = vsub.f32 1.0, %v386_v24 }
 0x30f   :  { %v388_v27 = vmul.f32 %v1411_v23, %v387_v25 }
 0x311   :  { %v389_v29 = vadd.f32 %v1411_v23, %v388_v27 }
 0x313   :  { %v393_v31 = vsel %vm392_vm10, %v1411_v23, %v389_v29 }
 0x314   :  { %v398_v32 = vsel %vm395_vm11, %v397_v30, %v393_v31 }
 0x315   :  { %405 = vrot.lane.b32.xlu2 %v398_v32, %s1611_s2  ;;  %401 = vrot.lane.b32.xlu0 %v398_v32, %s1612_s17 }
 0x36f   :  { %v406_v47 = vpop.permute.xlu2 %405 }
 0x372   :  { %v404_v41 = vpop.permute.xlu1 %403 }
 0x373   :  { %v408_v43 = vmul.f32 %v404_v41, %v398_v32  ;;  %v1351_v41 = vld [vmem:[#allocation7 + $0x28] sm:$0xff] }
 0x374   :  { %715 = vmatpush.bf16.msrb.mxu1 %v1351_v41 }
 0x387   :  { %v402_v42 = vpop.permute.xlu0 %401 }
 0x388   :  { %v407_v44 = vmul.f32 %v402_v42, %v294_v10  ;;  %v1339_v10 = vld [vmem:[#allocation7 + $0x8] sm:$0xff]  ;;  %v1350_v42 = vld [vmem:[#allocation7 + $0x20] sm:$0xff] }
 0x389   :  { %604 = vmatpush.bf16.msrb.mxu0 %v1339_v10  ;;  %716 = vmatpush.bf16.msrb.mxu1 %v1350_v42  ;;  %v1361_v10 = vld [vmem:[#allocation7 + $0x38] sm:$0xff] }
 0x38a   :  { %v409_v45 = vadd.f32 %v408_v43, %v407_v44  ;;  %v1349_v43 = vld [vmem:[#allocation7 + $0x18] sm:$0xff]  ;;  %v1348_v44 = vld [vmem:[#allocation7 + $0x10] sm:$0xff]  ;;  %828 = vmatpush.bf16.msrb.mxu2 %v1361_v10 }
 0x38c   :  { %1412 = vtanh.f32 %v409_v45 }
 0x38d   :  { %605 = vmatpush.bf16.msrb.mxu0 %v1338_v11  ;;  %717 = vmatpush.bf16.msrb.mxu1 %v1349_v43  ;;  %v1360_v11 = vld [vmem:[#allocation7 + $0x30] sm:$0xff] }
 0x38e   :  { %829 = vmatpush.bf16.msrb.mxu2 %v1360_v11 }
 0x391   :  { %718 = vmatpush.bf16.msrb.mxu1 %v1348_v44 }
 0x392   :  { %v1413_v46 = vpop.eup %1412 }
 0x393   :  { %v411_v48 = vmul.f32 %v1413_v46, %v406_v47  ;;  %v1346_v46 = vld [vmem:[#allocation7] sm:$0xff] }
 0x395   :  { %413 = vst [vmem:[#allocation8 + $0x30] sm:$0xff] %v411_v48  ;;  %v414_v49 = vpack.c.bf16 %v411_v48, %v411_v48 }
 0x397   :  { %491 = vmatmul.bf16.vlgmr.msra.gmra.mxu3 %v414_v49 }
 0x41a   :  { %v492_v51 = vpop.f32.mrf.mxu3 }
 0x41b   :  { %v493_v52 = vadd.f32 %v1385_v50, %v492_v51 }
 0x41d   :  { %v1173_v53 = vmul.f32 -1.442695, %v493_v52  ;;  %1414 = vtanh.f32 %v493_v52 }
 0x41f   :  { %1416 = vpow2.f32 %v1173_v53 }
 0x422   :  { %v494_v54 = vpop.f32.mrf.mxu3 }
 0x423   :  { %v1415_v55 = vpop.eup %1414 }
 0x424   :  { %518 = vrot.lane.b32.xlu1 %v1415_v55, %s1607_s9 }
 0x425   :  { %v1417_v56 = vpop.eup %1416 }
 0x426   :  { %v499_v57 = vadd.f32 1.0, %v1417_v56  ;;  %v1387_v56 = vld [vmem:[%s1732_s4] ss:$0 sm:$0xff] }
 0x428   :  { %1418 = vrcp.f32 %v499_v57  ;;  %v511_v61 = vand.u32 2147483648, %v499_v57  ;;  %v509_v63 = vand.u32 2147483647, %v499_v57  ;;  %vm505_vm13 = vweird.f32 %v499_v57 }
 0x42a   :  { %v512_v1 = vor.u32 1.1754944e-38, %v511_v61  ;;  %vm510_vm15 = vcmp.eq.f32.partialorder %v509_v63, 8.507059e+37 }
 0x42e   :  { %v1419_v58 = vpop.eup %1418 }
 0x42f   :  { %v501_v59 = vmul.f32 %v1419_v58, %v499_v57  ;;  %vm506_vm12 = vweird.f32 %v1419_v58 }
 0x430   :  { %vm507_vm14 = vmor %vm505_vm13, %vm506_vm12 }
 0x431   :  { %v502_v60 = vsub.f32 1.0, %v501_v59 }
 0x433   :  { %v503_v62 = vmul.f32 %v1419_v58, %v502_v60 }
 0x435   :  { %v504_v0 = vadd.f32 %v1419_v58, %v503_v62 }
 0x437   :  { %v508_v2 = vsel %vm507_vm14, %v1419_v58, %v504_v0 }
 0x438   :  { %v513_v3 = vsel %vm510_vm15, %v512_v1, %v508_v2 }
 0x439   :  { %520 = vrot.lane.b32.xlu2 %v513_v3, %s1611_s2  ;;  %516 = vrot.lane.b32.xlu0 %v513_v3, %s1612_s17 }
 0x493   :  { %v521_v18 = vpop.permute.xlu2 %520 }
 0x496   :  { %v519_v12 = vpop.permute.xlu1 %518 }
 0x497   :  { %v523_v14 = vmul.f32 %v519_v12, %v513_v3  ;;  %v1359_v12 = vld [vmem:[#allocation7 + $0x28] sm:$0xff] }
 0x498   :  { %830 = vmatpush.bf16.msrb.mxu2 %v1359_v12 }
 0x4ab   :  { %v517_v13 = vpop.permute.xlu0 %516 }
 0x4ac   :  { %v522_v15 = vmul.f32 %v517_v13, %v409_v45  ;;  %v1347_v45 = vld [vmem:[#allocation7 + $0x8] sm:$0xff]  ;;  %v1358_v13 = vld [vmem:[#allocation7 + $0x20] sm:$0xff] }
 0x4ad   :  { %719 = vmatpush.bf16.msrb.mxu1 %v1347_v45  ;;  %831 = vmatpush.bf16.msrb.mxu2 %v1358_v13  ;;  %v1369_v45 = vld [vmem:[#allocation7 + $0x38] sm:$0xff] }
 0x4ae   :  { %v524_v16 = vadd.f32 %v523_v14, %v522_v15  ;;  %v1357_v14 = vld [vmem:[#allocation7 + $0x18] sm:$0xff]  ;;  %v1356_v15 = vld [vmem:[#allocation7 + $0x10] sm:$0xff]  ;;  %943 = vmatpush.bf16.msrb.mxu3 %v1369_v45 }
 0x4b0   :  { %1420 = vtanh.f32 %v524_v16 }
 0x4b1   :  { %720 = vmatpush.bf16.msrb.mxu1 %v1346_v46  ;;  %832 = vmatpush.bf16.msrb.mxu2 %v1357_v14  ;;  %v1368_v46 = vld [vmem:[#allocation7 + $0x30] sm:$0xff] }
 0x4b2   :  { %944 = vmatpush.bf16.msrb.mxu3 %v1368_v46 }
 0x4b5   :  { %833 = vmatpush.bf16.msrb.mxu2 %v1356_v15 }
 0x4b6   :  { %v1421_v17 = vpop.eup %1420 }
 0x4b7   :  { %v526_v19 = vmul.f32 %v1421_v17, %v521_v18  ;;  %v1354_v17 = vld [vmem:[#allocation7] sm:$0xff] }
 0x4b9   :  { %528 = vst [vmem:[#allocation8 + $0x28] sm:$0xff] %v526_v19  ;;  %v529_v20 = vpack.c.bf16 %v526_v19, %v526_v19 }
 0x4bb   :  { %606 = vmatmul.bf16.vlgmr.msrb.gmra.mxu0 %v529_v20 }
 0x538   :  { %v607_v22 = vpop.f32.mrf.mxu0 }
 0x539   :  { %v608_v23 = vadd.f32 %v1386_v21, %v607_v22 }
 0x53b   :  { %v1206_v24 = vmul.f32 -1.442695, %v608_v23  ;;  %1422 = vtanh.f32 %v608_v23 }
 0x53d   :  { %1424 = vpow2.f32 %v1206_v24 }
 0x540   :  { %v609_v25 = vpop.f32.mrf.mxu0 }
 0x541   :  { %v1423_v26 = vpop.eup %1422 }
 0x542   :  { %633 = vrot.lane.b32.xlu1 %v1423_v26, %s1607_s9 }
 0x543   :  { %v1425_v27 = vpop.eup %1424 }
 0x544   :  { %v614_v28 = vadd.f32 1.0, %v1425_v27  ;;  %v1388_v27 = vld [vmem:[%s1732_s4] ss:$0 sm:$0xff] }
 0x546   :  { %1426 = vrcp.f32 %v614_v28  ;;  %v626_v32 = vand.u32 2147483648, %v614_v28  ;;  %v624_v34 = vand.u32 2147483647, %v614_v28  ;;  %vm620_vm1 = vweird.f32 %v614_v28 }
 0x548   :  { %v627_v36 = vor.u32 1.1754944e-38, %v626_v32  ;;  %vm625_vm3 = vcmp.eq.f32.partialorder %v624_v34, 8.507059e+37 }
 0x54c   :  { %v1427_v29 = vpop.eup %1426 }
 0x54d   :  { %v616_v30 = vmul.f32 %v1427_v29, %v614_v28  ;;  %vm621_vm0 = vweird.f32 %v1427_v29 }
 0x54e   :  { %vm622_vm2 = vmor %vm620_vm1, %vm621_vm0 }
 0x54f   :  { %v617_v31 = vsub.f32 1.0, %v616_v30 }
 0x551   :  { %v618_v33 = vmul.f32 %v1427_v29, %v617_v31 }
 0x553   :  { %v619_v35 = vadd.f32 %v1427_v29, %v618_v33 }
 0x555   :  { %v623_v37 = vsel %vm622_vm2, %v1427_v29, %v619_v35 }
 0x556   :  { %v628_v38 = vsel %vm625_vm3, %v627_v36, %v623_v37 }
 0x557   :  { %635 = vrot.lane.b32.xlu2 %v628_v38, %s1611_s2  ;;  %631 = vrot.lane.b32.xlu0 %v628_v38, %s1612_s17 }
 0x5b1   :  { %v636_v53 = vpop.permute.xlu2 %635 }
 0x5b4   :  { %v634_v47 = vpop.permute.xlu1 %633 }
 0x5b5   :  { %v638_v49 = vmul.f32 %v634_v47, %v628_v38  ;;  %v1367_v47 = vld [vmem:[#allocation7 + $0x28] sm:$0xff] }
 0x5b6   :  { %945 = vmatpush.bf16.msrb.mxu3 %v1367_v47 }
 0x5c9   :  { %v632_v48 = vpop.permute.xlu0 %631 }
 0x5ca   :  { %v637_v50 = vmul.f32 %v632_v48, %v524_v16  ;;  %v1355_v16 = vld [vmem:[#allocation7 + $0x8] sm:$0xff]  ;;  %v1366_v48 = vld [vmem:[#allocation7 + $0x20] sm:$0xff] }
 0x5cb   :  { %834 = vmatpush.bf16.msrb.mxu2 %v1355_v16  ;;  %946 = vmatpush.bf16.msrb.mxu3 %v1366_v48 }
 0x5cc   :  { %v639_v51 = vadd.f32 %v638_v49, %v637_v50  ;;  %v1365_v49 = vld [vmem:[#allocation7 + $0x18] sm:$0xff]  ;;  %v1364_v50 = vld [vmem:[#allocation7 + $0x10] sm:$0xff] }
 0x5ce   :  { %1428 = vtanh.f32 %v639_v51 }
 0x5cf   :  { %835 = vmatpush.bf16.msrb.mxu2 %v1354_v17  ;;  %947 = vmatpush.bf16.msrb.mxu3 %v1365_v49 }
 0x5d3   :  { %948 = vmatpush.bf16.msrb.mxu3 %v1364_v50 }
 0x5d4   :  { %v1429_v52 = vpop.eup %1428 }
 0x5d5   :  { %v641_v54 = vmul.f32 %v1429_v52, %v636_v53  ;;  %v1362_v52 = vld [vmem:[#allocation7] sm:$0xff] }
 0x5d7   :  { %643 = vst [vmem:[#allocation8 + $0x20] sm:$0xff] %v641_v54  ;;  %v644_v55 = vpack.c.bf16 %v641_v54, %v641_v54 }
 0x5d9   :  { %721 = vmatmul.bf16.vlgmr.msrb.gmra.mxu1 %v644_v55 }
 0x656   :  { %v722_v57 = vpop.f32.mrf.mxu1 }
 0x657   :  { %v723_v58 = vadd.f32 %v1387_v56, %v722_v57 }
 0x659   :  { %v1239_v59 = vmul.f32 -1.442695, %v723_v58  ;;  %1430 = vtanh.f32 %v723_v58 }
 0x65b   :  { %1432 = vpow2.f32 %v1239_v59 }
 0x65e   :  { %v724_v60 = vpop.f32.mrf.mxu1 }
 0x65f   :  { %v1431_v61 = vpop.eup %1430 }
 0x660   :  { %748 = vrot.lane.b32.xlu1 %v1431_v61, %s1607_s9 }
 0x661   :  { %v1433_v62 = vpop.eup %1432 }
 0x662   :  { %v729_v63 = vadd.f32 1.0, %v1433_v62  ;;  %v1389_v62 = vld [vmem:[%s1732_s4] ss:$0 sm:$0xff]  ;;  %s1613_s4 = smov [#allocation8]  }
 0x664   :  { %1434 = vrcp.f32 %v729_v63  ;;  %v741_v3 = vand.u32 2147483648, %v729_v63  ;;  %v739_v5 = vand.u32 2147483647, %v729_v63  ;;  %vm735_vm5 = vweird.f32 %v729_v63 }
 0x666   :  { %v742_v7 = vor.u32 1.1754944e-38, %v741_v3  ;;  %vm740_vm7 = vcmp.eq.f32.partialorder %v739_v5, 8.507059e+37 }
 0x66a   :  { %v1435_v0 = vpop.eup %1434 }
 0x66b   :  { %v731_v1 = vmul.f32 %v1435_v0, %v729_v63  ;;  %vm736_vm4 = vweird.f32 %v1435_v0 }
 0x66c   :  { %vm737_vm6 = vmor %vm735_vm5, %vm736_vm4 }
 0x66d   :  { %v732_v2 = vsub.f32 1.0, %v731_v1 }
 0x66f   :  { %v733_v4 = vmul.f32 %v1435_v0, %v732_v2 }
 0x671   :  { %v734_v6 = vadd.f32 %v1435_v0, %v733_v4 }
 0x673   :  { %v738_v8 = vsel %vm737_vm6, %v1435_v0, %v734_v6 }
 0x674   :  { %v743_v9 = vsel %vm740_vm7, %v742_v7, %v738_v8 }
 0x675   :  { %750 = vrot.lane.b32.xlu2 %v743_v9, %s1611_s2  ;;  %746 = vrot.lane.b32.xlu0 %v743_v9, %s1612_s17 }
 0x6cf   :  { %v751_v24 = vpop.permute.xlu2 %750 }
 0x6d2   :  { %v749_v18 = vpop.permute.xlu1 %748 }
 0x6d3   :  { %v753_v20 = vmul.f32 %v749_v18, %v743_v9 }
 0x6e7   :  { %v747_v19 = vpop.permute.xlu0 %746 }
 0x6e8   :  { %v752_v21 = vmul.f32 %v747_v19, %v639_v51  ;;  %v1363_v51 = vld [vmem:[#allocation7 + $0x8] sm:$0xff] }
 0x6e9   :  { %949 = vmatpush.bf16.msrb.mxu3 %v1363_v51 }
 0x6ea   :  { %v754_v22 = vadd.f32 %v753_v20, %v752_v21 }
 0x6ec   :  { %1436 = vtanh.f32 %v754_v22 }
 0x6ed   :  { %950 = vmatpush.bf16.msrb.mxu3 %v1362_v52 }
 0x6f2   :  { %v1437_v23 = vpop.eup %1436 }
 0x6f3   :  { %v756_v25 = vmul.f32 %v1437_v23, %v751_v24 }
 0x6f5   :  { %758 = vst [vmem:[#allocation8 + $0x18] sm:$0xff] %v756_v25  ;;  %v759_v26 = vpack.c.bf16 %v756_v25, %v756_v25 }
 0x6f7   :  { %836 = vmatmul.bf16.vlgmr.msrb.gmra.mxu2 %v759_v26 }
 0x77a   :  { %v837_v28 = vpop.f32.mrf.mxu2 }
 0x77b   :  { %v838_v29 = vadd.f32 %v1388_v27, %v837_v28 }
 0x77d   :  { %v1272_v30 = vmul.f32 -1.442695, %v838_v29  ;;  %1438 = vtanh.f32 %v838_v29 }
 0x77f   :  { %1440 = vpow2.f32 %v1272_v30 }
 0x782   :  { %v839_v31 = vpop.f32.mrf.mxu2 }
 0x783   :  { %v1439_v32 = vpop.eup %1438 }
 0x784   :  { %863 = vrot.lane.b32.xlu1 %v1439_v32, %s1607_s9 }
 0x785   :  { %v1441_v33 = vpop.eup %1440 }
 0x786   :  { %v844_v34 = vadd.f32 1.0, %v1441_v33 }
 0x788   :  { %1442 = vrcp.f32 %v844_v34  ;;  %v856_v38 = vand.u32 2147483648, %v844_v34  ;;  %v854_v40 = vand.u32 2147483647, %v844_v34  ;;  %vm850_vm9 = vweird.f32 %v844_v34 }
 0x78a   :  { %v857_v42 = vor.u32 1.1754944e-38, %v856_v38  ;;  %vm855_vm11 = vcmp.eq.f32.partialorder %v854_v40, 8.507059e+37 }
 0x78e   :  { %v1443_v35 = vpop.eup %1442 }
 0x78f   :  { %v846_v36 = vmul.f32 %v1443_v35, %v844_v34  ;;  %vm851_vm8 = vweird.f32 %v1443_v35 }
 0x790   :  { %vm852_vm10 = vmor %vm850_vm9, %vm851_vm8 }
 0x791   :  { %v847_v37 = vsub.f32 1.0, %v846_v36 }
 0x793   :  { %v848_v39 = vmul.f32 %v1443_v35, %v847_v37 }
 0x795   :  { %v849_v41 = vadd.f32 %v1443_v35, %v848_v39 }
 0x797   :  { %v853_v43 = vsel %vm852_vm10, %v1443_v35, %v849_v41 }
 0x798   :  { %v858_v44 = vsel %vm855_vm11, %v857_v42, %v853_v43 }
 0x799   :  { %865 = vrot.lane.b32.xlu2 %v858_v44, %s1611_s2  ;;  %861 = vrot.lane.b32.xlu0 %v858_v44, %s1612_s17 }
 0x7f3   :  { %v866_v59 = vpop.permute.xlu2 %865 }
 0x7f6   :  { %v864_v53 = vpop.permute.xlu1 %863 }
 0x7f7   :  { %v868_v55 = vmul.f32 %v864_v53, %v858_v44 }
 0x80b   :  { %v862_v54 = vpop.permute.xlu0 %861 }
 0x80c   :  { %v867_v56 = vmul.f32 %v862_v54, %v754_v22 }
 0x80e   :  { %v869_v57 = vadd.f32 %v868_v55, %v867_v56 }
 0x810   :  { %1444 = vtanh.f32 %v869_v57 }
 0x816   :  { %v1445_v58 = vpop.eup %1444 }
 0x817   :  { %v871_v60 = vmul.f32 %v1445_v58, %v866_v59 }
 0x819   :  { %873 = vst [vmem:[#allocation8 + $0x10] sm:$0xff] %v871_v60  ;;  %v874_v61 = vpack.c.bf16 %v871_v60, %v871_v60 }
 0x81b   :  { %951 = vmatmul.bf16.vlgmr.msrb.gmra.mxu3 %v874_v61 }
 0x89e   :  { %v952_v63 = vpop.f32.mrf.mxu3 }
 0x89f   :  { %v953_v0 = vadd.f32 %v1389_v62, %v952_v63 }
 0x8a1   :  { %v1305_v1 = vmul.f32 -1.442695, %v953_v0  ;;  %1446 = vtanh.f32 %v953_v0 }
 0x8a3   :  { %1448 = vpow2.f32 %v1305_v1 }
 0x8a6   :  { %v954_v2 = vpop.f32.mrf.mxu3 }
 0x8a7   :  { %v1447_v3 = vpop.eup %1446 }
 0x8a8   :  { %978 = vrot.lane.b32.xlu1 %v1447_v3, %s1607_s9  ;;  %s995_s9 = sshll.u32 %s1613_s4, 4  ;;  %s996_s9 = int_to_ptr.vmem [resolvable:$true] %s995_s9 }
 0x8a9   :  { %v1449_v4 = vpop.eup %1448 }
 0x8aa   :  { %v959_v5 = vadd.f32 1.0, %v1449_v4 }
 0x8ac   :  { %1450 = vrcp.f32 %v959_v5  ;;  %v971_v9 = vand.u32 2147483648, %v959_v5  ;;  %v969_v11 = vand.u32 2147483647, %v959_v5  ;;  %vm965_vm13 = vweird.f32 %v959_v5 }
 0x8ae   :  { %v972_v13 = vor.u32 1.1754944e-38, %v971_v9  ;;  %vm970_vm15 = vcmp.eq.f32.partialorder %v969_v11, 8.507059e+37 }
 0x8b2   :  { %v1451_v6 = vpop.eup %1450 }
 0x8b3   :  { %v961_v7 = vmul.f32 %v1451_v6, %v959_v5  ;;  %vm966_vm12 = vweird.f32 %v1451_v6 }
 0x8b4   :  { %vm967_vm14 = vmor %vm965_vm13, %vm966_vm12 }
 0x8b5   :  { %v962_v8 = vsub.f32 1.0, %v961_v7 }
 0x8b7   :  { %v963_v10 = vmul.f32 %v1451_v6, %v962_v8 }
 0x8b9   :  { %v964_v12 = vadd.f32 %v1451_v6, %v963_v10 }
 0x8bb   :  { %v968_v14 = vsel %vm967_vm14, %v1451_v6, %v964_v12 }
 0x8bc   :  { %v973_v15 = vsel %vm970_vm15, %v972_v13, %v968_v14 }
 0x8bd   :  { %980 = vrot.lane.b32.xlu2 %v973_v15, %s1611_s2  ;;  %976 = vrot.lane.b32.xlu0 %v973_v15, %s1612_s17 }
 0x917   :  { %v981_v22 = vpop.permute.xlu2 %980 }
 0x91a   :  { %v979_v16 = vpop.permute.xlu1 %978 }
 0x91b   :  { %v983_v18 = vmul.f32 %v979_v16, %v973_v15 }
 0x92f   :  { %v977_v17 = vpop.permute.xlu0 %976 }
 0x930   :  { %v982_v19 = vmul.f32 %v977_v17, %v869_v57 }
 0x932   :  { %v984_v20 = vadd.f32 %v983_v18, %v982_v19 }
 0x934   :  { %1452 = vtanh.f32 %v984_v20  ;;  %990 = vst [vmem:[#allocation11] sm:$0xff] %v984_v20 }
 0x93a   :  { %v1453_v21 = vpop.eup %1452 }
 0x93b   :  { %v986_v23 = vmul.f32 %v1453_v21, %v981_v22 }
 0x93d   :  { %988 = vst [vmem:[#allocation8 + $0x8] sm:$0xff] %v986_v23 }
 0x93e   :  { %989 = vst [vmem:[#allocation9] sm:$0xff] %v986_v23  ;;  %1003 = dma.vmem_to_hbm [thread:$0]  %s996_s9, 1024, %s998_s12, [#allocation4], %s1616_s5, %s1616_s5, %s1617_s19  }
 0x93f   :  { %1014 = dma.vmem_to_hbm [thread:$0]  %s1010_s14, 128, %s1012_s16, [#allocation10]  }
 0x940   :  { %1025 = dma.vmem_to_hbm [thread:$0]  %s1021_s3, 128, %s1023_s18, [#allocation10]  }
 0x941   :  { %1602 = dma.done.wait [#allocation4], 1024  }
 0x942   :  { %1603 = vsyncadd [#allocation4], 4294966272 }
 0x943   :  { %1604 = dma.done.wait [#allocation10], 256  }
 0x944   :  { %1605 = vsyncadd [#allocation10], 4294967040 }
 0x945   :  { %1038 = vsyncpa [#allocation3], 1 }
 0x946   :  { %1039 = vsyncpa [#allocation6], 1 }
 0x947   :  { %1040 = vsyncpa [#allocation4], 1 }
 0x948   :  { %1041 = vsyncpa [#allocation10], 1 }

</bundles_post_ra>
